<compile_context>
chip_gen: v5e
topology: v5e:2x2
jax: 0.10.0
libtpu: 0.0.40
codegen_flags: <defaults>
</compile_context>

<pallas_src>
import functools
import math

import jax
import jax.numpy as jnp
from jax.experimental import pallas as pl
from jax.experimental.pallas import tpu as pltpu


def _round_up(x, m):
    return ((x + m - 1) // m) * m


def _mix32(x):
    """lowbias32-style avalanche hash on uint32 (xor-shift-multiply)."""
    x = x ^ (x >> 16)
    x = x * jnp.uint32(0x7FEB352D)
    x = x ^ (x >> 15)
    x = x * jnp.uint32(0x846CA68B)
    x = x ^ (x >> 16)
    return x


def _random_embedding_kernel(seed_ref, out_ref, *, valid_dim):
    tile_b, d_pad = out_ref.shape
    half_b = tile_b // 2
    pid = pl.program_id(0)

    # Unique per-element counter over this tile's (half_b, d_pad) uniform grid.
    row = jax.lax.broadcasted_iota(jnp.int32, (half_b, d_pad), 0)
    col = jax.lax.broadcasted_iota(jnp.int32, (half_b, d_pad), 1)
    gc = (pid * half_b + row) * d_pad + col
    c = gc.astype(jnp.uint32) * jnp.uint32(2)

    base = seed_ref[0].astype(jnp.uint32) * jnp.uint32(0x9E3779B9)

    bits1 = _mix32(c + base)
    bits2 = _mix32(c + base + jnp.uint32(1))

    # 24-bit mantissa uniforms, strictly inside (0, 1) so log() is finite.
    inv24 = jnp.float32(1.0 / (1 << 24))
    u1 = ((bits1 >> 8).astype(jnp.float32) + 0.5) * inv24
    u2 = ((bits2 >> 8).astype(jnp.float32) + 0.5) * inv24

    # Box-Muller: use BOTH outputs (cos and sin branches), stacked along sublanes.
    r = jnp.sqrt(jnp.float32(-2.0) * jnp.log(u1))
    theta = jnp.float32(2.0 * math.pi) * u2
    z = jnp.concatenate([r * jnp.cos(theta), r * jnp.sin(theta)], axis=0)

    # Zero padded lanes so they do not contribute to the L2 norm.
    lane = jax.lax.broadcasted_iota(jnp.int32, (tile_b, d_pad), 1)
    z = jnp.where(lane < valid_dim, z, jnp.float32(0.0))

    # F.normalize(x, dim=-1, eps=1e-12): x / max(||x||, eps)  ==  x * rsqrt(max(||x||^2, eps^2))
    sumsq = jnp.sum(z * z, axis=-1, keepdims=True)
    inv_norm = jax.lax.rsqrt(jnp.maximum(sumsq, jnp.float32(1e-24)))
    out_ref[...] = z * inv_norm


def random_embedding(x, out_dim, seed=0):
    """Pallas equivalent of RandomEmbedding(out_dim).forward(x).

    Only x.shape[0] (the batch size) is used, matching the PyTorch module.
    Output is distributionally equivalent to torch.normal + F.normalize (the
    exact PRNG stream of torch cannot be reproduced).
    """
    batch = x.shape[0]
    d = out_dim + 1
    d_pad = _round_up(d, 128)           # lane-dense last dim
    tile_b = min(512, _round_up(max(batch, 1), 8))
    b_pad = _round_up(batch, tile_b)
    grid = (b_pad // tile_b,)

    seed_arr = jnp.asarray([seed], dtype=jnp.int32)

    out = pl.pallas_call(
        functools.partial(_random_embedding_kernel, valid_dim=d),
        out_shape=jax.ShapeDtypeStruct((b_pad, d_pad), jnp.float32),
        grid=grid,
        in_specs=[pl.BlockSpec(memory_space=pltpu.MemorySpace.SMEM)],
        out_specs=pl.BlockSpec((tile_b, d_pad), lambda i: (i, 0)),
        compiler_params=pltpu.CompilerParams(
            dimension_semantics=("parallel",)),
    )(seed_arr)

    # Strip batch / lane padding.
    return out[:batch, :d]


if __name__ == "__main__":
    key = jax.random.PRNGKey(0)
    # NCHW example input, consistent with a conv-style upstream module.
    x = jax.random.normal(key, (2, 4, 16, 16), dtype=jnp.float32)
    out_dim = 32

    y = random_embedding(x, out_dim, seed=0)
    y = jax.block_until_ready(y)

    assert y.shape == (2, out_dim + 1), y.shape
    assert y.dtype == jnp.float32, y.dtype
    # Each row must be unit L2-norm after F.normalize(dim=-1).
    norms = jnp.linalg.norm(y, axis=-1)
    assert jnp.allclose(norms, 1.0, atol=1e-5), norms
    # Rows should be distinct (independent random draws).
    assert not jnp.allclose(y[0], y[1])

    print("KERNEL_OK")
</pallas_src>

<mosaic_0001>
module attributes {stable_mosaic.version = 11 : i64} {
  func.func @_random_embedding_kernel(%arg0: i32, %arg1: memref<1xi32, #tpu.memory_space<smem>>, %arg2: memref<8x128xf32, #tpu.memory_space<vmem>>) attributes {dimension_semantics = [#tpu.dimension_semantics<parallel>], iteration_bounds = array<i64: 1>, scalar_prefetch = 0 : i64, scratch_operands = 0 : i64, tpu.core_type = #tpu.core_type<tc>, window_params = [{transform_indices = @transform_0, window_bounds = array<i64: 1>}, {transform_indices = @transform_1, window_bounds = array<i64: 8, 128>}]} {
    %0 = tpu.iota {dimensions = array<i32: 0>} : vector<4x128xi32>
    %1 = tpu.iota {dimensions = array<i32: 1>} : vector<4x128xi32>
    %c4_i32 = arith.constant 4 : i32
    %2 = arith.muli %arg0, %c4_i32 : i32
    %3 = vector.broadcast %2 : i32 to vector<4x128xi32>
    %4 = arith.addi %3, %0 : vector<4x128xi32>
    %c128_i32 = arith.constant 128 : i32
    %5 = vector.broadcast %c128_i32 : i32 to vector<4x128xi32>
    %6 = arith.muli %4, %5 : vector<4x128xi32>
    %7 = arith.addi %6, %1 : vector<4x128xi32>
    %c2_i32 = arith.constant 2 : i32
    %8 = vector.broadcast %c2_i32 : i32 to vector<4x128xi32>
    %9 = arith.muli %7, %8 : vector<4x128xi32>
    %c0 = arith.constant 0 : index
    %10 = memref.load %arg1[%c0] : memref<1xi32, #tpu.memory_space<smem>>
    %c-1640531527_i32 = arith.constant -1640531527 : i32
    %11 = arith.muli %10, %c-1640531527_i32 : i32
    %12 = vector.broadcast %11 : i32 to vector<4x128xi32>
    %13 = arith.addi %9, %12 : vector<4x128xi32>
    %c16_i32 = arith.constant 16 : i32
    %14 = vector.broadcast %c16_i32 : i32 to vector<4x128xi32>
    %15 = arith.shrui %13, %14 : vector<4x128xi32>
    %16 = arith.xori %13, %15 : vector<4x128xi32>
    %c2146121005_i32 = arith.constant 2146121005 : i32
    %17 = vector.broadcast %c2146121005_i32 : i32 to vector<4x128xi32>
    %18 = arith.muli %16, %17 : vector<4x128xi32>
    %c15_i32 = arith.constant 15 : i32
    %19 = vector.broadcast %c15_i32 : i32 to vector<4x128xi32>
    %20 = arith.shrui %18, %19 : vector<4x128xi32>
    %21 = arith.xori %18, %20 : vector<4x128xi32>
    %c-2073254261_i32 = arith.constant -2073254261 : i32
    %22 = vector.broadcast %c-2073254261_i32 : i32 to vector<4x128xi32>
    %23 = arith.muli %21, %22 : vector<4x128xi32>
    %c16_i32_0 = arith.constant 16 : i32
    %24 = vector.broadcast %c16_i32_0 : i32 to vector<4x128xi32>
    %25 = arith.shrui %23, %24 : vector<4x128xi32>
    %26 = arith.xori %23, %25 : vector<4x128xi32>
    %27 = vector.broadcast %11 : i32 to vector<4x128xi32>
    %28 = arith.addi %9, %27 : vector<4x128xi32>
    %c1_i32 = arith.constant 1 : i32
    %29 = vector.broadcast %c1_i32 : i32 to vector<4x128xi32>
    %30 = arith.addi %28, %29 : vector<4x128xi32>
    %c16_i32_1 = arith.constant 16 : i32
    %31 = vector.broadcast %c16_i32_1 : i32 to vector<4x128xi32>
    %32 = arith.shrui %30, %31 : vector<4x128xi32>
    %33 = arith.xori %30, %32 : vector<4x128xi32>
    %c2146121005_i32_2 = arith.constant 2146121005 : i32
    %34 = vector.broadcast %c2146121005_i32_2 : i32 to vector<4x128xi32>
    %35 = arith.muli %33, %34 : vector<4x128xi32>
    %c15_i32_3 = arith.constant 15 : i32
    %36 = vector.broadcast %c15_i32_3 : i32 to vector<4x128xi32>
    %37 = arith.shrui %35, %36 : vector<4x128xi32>
    %38 = arith.xori %35, %37 : vector<4x128xi32>
    %c-2073254261_i32_4 = arith.constant -2073254261 : i32
    %39 = vector.broadcast %c-2073254261_i32_4 : i32 to vector<4x128xi32>
    %40 = arith.muli %38, %39 : vector<4x128xi32>
    %c16_i32_5 = arith.constant 16 : i32
    %41 = vector.broadcast %c16_i32_5 : i32 to vector<4x128xi32>
    %42 = arith.shrui %40, %41 : vector<4x128xi32>
    %43 = arith.xori %40, %42 : vector<4x128xi32>
    %c8_i32 = arith.constant 8 : i32
    %44 = vector.broadcast %c8_i32 : i32 to vector<4x128xi32>
    %45 = arith.shrui %26, %44 : vector<4x128xi32>
    %46 = arith.uitofp %45 : vector<4x128xi32> to vector<4x128xf32>
    %cst = arith.constant 5.000000e-01 : f32
    %47 = vector.broadcast %cst : f32 to vector<4x128xf32>
    %48 = arith.addf %46, %47 : vector<4x128xf32>
    %cst_6 = arith.constant 5.96046448E-8 : f32
    %49 = vector.broadcast %cst_6 : f32 to vector<4x128xf32>
    %50 = arith.mulf %48, %49 : vector<4x128xf32>
    %c8_i32_7 = arith.constant 8 : i32
    %51 = vector.broadcast %c8_i32_7 : i32 to vector<4x128xi32>
    %52 = arith.shrui %43, %51 : vector<4x128xi32>
    %53 = arith.uitofp %52 : vector<4x128xi32> to vector<4x128xf32>
    %cst_8 = arith.constant 5.000000e-01 : f32
    %54 = vector.broadcast %cst_8 : f32 to vector<4x128xf32>
    %55 = arith.addf %53, %54 : vector<4x128xf32>
    %cst_9 = arith.constant 5.96046448E-8 : f32
    %56 = vector.broadcast %cst_9 : f32 to vector<4x128xf32>
    %57 = arith.mulf %55, %56 : vector<4x128xf32>
    %58 = math.log %50 : vector<4x128xf32>
    %cst_10 = arith.constant -2.000000e+00 : f32
    %59 = vector.broadcast %cst_10 : f32 to vector<4x128xf32>
    %60 = arith.mulf %59, %58 : vector<4x128xf32>
    %61 = math.sqrt %60 : vector<4x128xf32>
    %cst_11 = arith.constant 6.28318548 : f32
    %62 = vector.broadcast %cst_11 : f32 to vector<4x128xf32>
    %63 = arith.mulf %62, %57 : vector<4x128xf32>
    %64 = math.cos %63 : vector<4x128xf32>
    %65 = arith.mulf %61, %64 : vector<4x128xf32>
    %66 = math.sin %63 : vector<4x128xf32>
    %67 = arith.mulf %61, %66 : vector<4x128xf32>
    %68 = tpu.concatenate %65, %67 in 0 : vector<4x128xf32>, vector<4x128xf32> -> vector<8x128xf32>
    %69 = tpu.iota {dimensions = array<i32: 1>} : vector<8x128xi32>
    %c33_i32 = arith.constant 33 : i32
    %70 = vector.broadcast %c33_i32 : i32 to vector<8x128xi32>
    %71 = arith.cmpi slt, %69, %70 : vector<8x128xi32>
    %cst_12 = arith.constant 0.000000e+00 : f32
    %72 = vector.broadcast %cst_12 : f32 to vector<8x128xf32>
    %73 = arith.select %71, %68, %72 : vector<8x128xi1>, vector<8x128xf32>
    %74 = arith.mulf %73, %73 : vector<8x128xf32>
    %cst_13 = arith.constant dense<0.000000e+00> : vector<8xf32>
    %75 = vector.multi_reduction <add>, %74, %cst_13 [1] : vector<8x128xf32> to vector<8xf32>
    %76 = vector.shape_cast %75 : vector<8xf32> to vector<8x1xf32>
    %cst_14 = arith.constant 1.000000e-24 : f32
    %77 = vector.broadcast %cst_14 : f32 to vector<8x1xf32>
    %78 = arith.maximumf %76, %77 : vector<8x1xf32>
    %79 = math.rsqrt %78 : vector<8x1xf32>
    %80 = vector.broadcast %79 : vector<8x1xf32> to vector<8x128xf32>
    %81 = arith.mulf %73, %80 : vector<8x128xf32>
    %c0_15 = arith.constant 0 : index
    %c0_16 = arith.constant 0 : index
    %82 = vector.load %arg2[%c0_15, %c0_16] : memref<8x128xf32, #tpu.memory_space<vmem>>, vector<8x128xf32>
    tpu.vector_store %arg2[%c0_15, %c0_16], %81 {strides = array<i32>} : memref<8x128xf32, #tpu.memory_space<vmem>>, vector<8x128xf32>,
    return
  }
  func.func @transform_0(%arg0: i32) -> i32 {
    %c0_i32 = arith.constant 0 : i32
    %c0_i32_0 = arith.constant 0 : i32
    return %c0_i32 : i32
  }
  func.func @transform_1(%arg0: i32) -> (i32, i32) {
    %c0_i32 = arith.constant 0 : i32
    %c0_i32_0 = arith.constant 0 : i32
    return %arg0, %c0_i32 : i32, i32
  }
}

</mosaic_0001>

<bundles_post_ra>
// kernel: tpu_custom_call.1
= control target key start
LH: loop header
LB: loop body
LE: loop exit
PB: predicated region body
PF: predicated region fallthrough
CT: control target
= control target key end

     0   :  { %7 = vsyncpa [#allocation4], 0  ;;  %v10_v0 = vlaneseq  ;;  %v471_v47 = vmov 683565275   ;;  %v472_v49 = vmov 2475754826   ;;  %s554_s0 = inlined_call_operand.<no memory space> [shape: s32[1], index: 0, kind: input, shape index: {}]   ;;  %s555_s1 = inlined_call_operand.hbm [shape: f32[8,128], index: 1, kind: output, shape index: {}]  }
   0x1   :  { %s21_s8 = smul.u32 2654435769, %s554_s0  ;;  %v473_v51 = vmov 2131351028   ;;  %v474_v53 = vmov 2102212464  }
   0x2   :  { %v11_v1 = vshrl.u32 %v10_v0, 7  ;;  %v489_v2 = vand.u32 127, %v10_v0  ;;  %v475_v55 = vmov 920167782   ;;  %v476_v62 = vmov 1326507024  }
   0x3   :  { %v22_v5 = vstv %s21_s8  ;;  %s478_s0 = smov [#allocation3]   ;;  %s416_s12 = sshll.u32 %s555_s1, 4  ;;  %s417_s12 = int_to_ptr.hbm [resolvable:$true] %s416_s12 }
   0x4   :  { %v17_v3 = vmul.u32 128, %v11_v1  ;;  %s414_s9 = sshll.u32 %s478_s0, 4  ;;  %s415_s9 = int_to_ptr.vmem [resolvable:$true] %s414_s9 }
   0x6   :  { %v18_v4 = vadd.s32 %v17_v3, %v489_v2 }
   0x8   :  { %v19_v6 = vmul.u32 2, %v18_v4 }
   0xa   :  { %v23_v7 = vadd.s32 %v22_v5, %v19_v6 }
   0xc   :  { %v32_v8 = vadd.s32 1, %v23_v7  ;;  %v24_v14 = vshrl.u32 %v23_v7, 16 }
   0xe   :  { %v33_v9 = vshrl.u32 %v32_v8, 16  ;;  %v25_v17 = vxor.u32 %v24_v14, %v23_v7 }
  0x10   :  { %v34_v10 = vxor.u32 %v33_v9, %v32_v8  ;;  %v26_v20 = vmul.u32 2146121005, %v25_v17 }
  0x12   :  { %v35_v11 = vmul.u32 2146121005, %v34_v10  ;;  %v27_v25 = vshrl.u32 %v26_v20, 15 }
  0x14   :  { %v36_v12 = vshrl.u32 %v35_v11, 15  ;;  %v28_v28 = vxor.u32 %v27_v25, %v26_v20 }
  0x16   :  { %v37_v13 = vxor.u32 %v36_v12, %v35_v11  ;;  %v29_v31 = vmul.u32 2221713035, %v28_v28 }
  0x18   :  { %v38_v15 = vmul.u32 2221713035, %v37_v13  ;;  %v30_v34 = vshrl.u32 %v29_v31, 16 }
  0x1a   :  { %v39_v16 = vshrl.u32 %v38_v15, 16  ;;  %v31_v38 = vxor.u32 %v30_v34, %v29_v31 }
  0x1c   :  { %v40_v18 = vxor.u32 %v39_v16, %v38_v15  ;;  %v41_v42 = vshrl.u32 %v31_v38, 8 }
  0x1e   :  { %v50_v19 = vshrl.u32 %v40_v18, 8  ;;  %v42_v57 = vshrl.u32 %v41_v42, 16  ;;  %v43_v7 = vand.u32 65535, %v41_v42 }
  0x20   :  { %v51_v21 = vshrl.u32 %v50_v19, 16  ;;  %v52_v22 = vand.u32 65535, %v50_v19  ;;  %v44_v9 = vcvt.s32.f32 %v42_v57 }
  0x22   :  { %v53_v23 = vcvt.s32.f32 %v51_v21  ;;  %v55_v24 = vcvt.s32.f32 %v52_v22  ;;  %v45_v22 = vmul.f32 65536.0, %v44_v9 }
  0x24   :  { %v54_v26 = vmul.f32 65536.0, %v53_v23  ;;  %v46_v23 = vcvt.s32.f32 %v43_v7 }
  0x26   :  { %v56_v27 = vadd.f32 %v55_v24, %v54_v26 }
  0x28   :  { %v57_v29 = vadd.f32 0.5, %v56_v27 }
  0x2a   :  { %v58_v30 = vmul.f32 5.9604645e-08, %v57_v29 }
  0x2c   :  { %v495_v32 = vmul.f32 6.2831855, %v58_v30 }
  0x2e   :  { %v78_v33 = vand.u32 2139095040, %v495_v32  ;;  %v75_v36 = vand.u32 2147483647, %v495_v32  ;;  %vm77_vm12 = vcmp.lt.s32.totalorder %v495_v32, 0 }
  0x30   :  { %v79_v35 = vshrl.u32 %v78_v33, 23  ;;  %v82_v40 = vand.u32 8388607, %v75_v36  ;;  %vm76_vm13 = vcmp.le.f32.partialorder %v75_v36, 0.7853982 }
  0x32   :  { %v425_v37 = vadd.s32 4294967169, %v79_v35  ;;  %v83_v45 = vor.u32 8388608, %v82_v40 }
  0x34   :  { %v85_v39 = vadd.s32 1, %v425_v37  ;;  %v505_v3 = vshll.u32 %v83_v45, 8  ;;  %v47_v37 = vadd.f32 %v46_v23, %v45_v22  ;;  %v477_v45 = vmov 0  }
  0x36   :  { %vm86_vm0 = vcmp.gt.s32.totalorder %v85_v39, 0  ;;  %v124_v15 = vand.u32 65535, %v505_v3  ;;  %v125_v16 = vshrl.u32 %v505_v3, 16 }
  0x37   :  { %v87_v41 = vsel %vm86_vm0, %v85_v39, 0 }
  0x38   :  { %v89_v43 = vand.u32 31, %v87_v41  ;;  %v501_v44 = vshrl.u32 %v87_v41, 5 }
  0x3a   :  { %v90_v46 = vsub.s32 32, %v89_v43  ;;  %v92_v48 = vshll.u32 %v471_v47, %v89_v43  ;;  %v95_v50 = vshll.u32 %v472_v49, %v89_v43  ;;  %v98_v52 = vshll.u32 %v473_v51, %v89_v43 }
  0x3b   :  { %v101_v54 = vshll.u32 %v474_v53, %v89_v43  ;;  %v104_v56 = vshll.u32 %v475_v55, %v89_v43  ;;  %vm107_vm1 = vcmp.lt.s32.totalorder %v501_v44, 1  ;;  %vm110_vm2 = vcmp.lt.s32.totalorder %v501_v44, 4 }
  0x3c   :  { %v93_v58 = vshrl.u32 %v472_v49, %v90_v46  ;;  %v96_v59 = vshrl.u32 %v473_v51, %v90_v46  ;;  %v99_v60 = vshrl.u32 %v474_v53, %v90_v46  ;;  %v102_v61 = vshrl.u32 %v475_v55, %v90_v46 }
  0x3d   :  { %v105_v63 = vshrl.u32 %v476_v62, %v90_v46  ;;  %vm109_vm3 = vcmp.lt.s32.totalorder %v501_v44, 3  ;;  %vm108_vm4 = vcmp.lt.s32.totalorder %v501_v44, 2  ;;  %v91_v25 = vshrl.u32 %v471_v47, %v90_v46 }
  0x3e   :  { %v94_v0 = vor.u32 %v93_v58, %v92_v48  ;;  %v97_v1 = vor.u32 %v96_v59, %v95_v50  ;;  %v100_v4 = vor.u32 %v99_v60, %v98_v52  ;;  %v103_v5 = vor.u32 %v102_v61, %v101_v54 }
  0x3f   :  { %v106_v6 = vor.u32 %v105_v63, %v104_v56  ;;  %v48_v60 = vadd.f32 0.5, %v47_v37 }
  0x40   :  { %v115_v8 = vsel %vm107_vm1, %v94_v0, %v97_v1  ;;  %v116_v10 = vsel %vm110_vm2, %v103_v5, 920167782  ;;  %v119_v11 = vsel %vm107_vm1, %v97_v1, %v100_v4  ;;  %v111_v40 = vsel %vm107_vm1, %v91_v25, %v94_v0 }
  0x41   :  { %v120_v12 = vsel %vm110_vm2, %v106_v6, 1326507024  ;;  %v117_v13 = vsel %vm109_vm3, %v100_v4, %v116_v10  ;;  %v112_v43 = vsel %vm110_vm2, %v100_v4, 2102212464  ;;  %v49_v6 = vmul.f32 5.9604645e-08, %v48_v60 }
  0x42   :  { %v121_v14 = vsel %vm109_vm3, %v103_v5, %v120_v12  ;;  %v118_v17 = vsel %vm108_vm4, %v115_v8, %v117_v13  ;;  %v113_v54 = vsel %vm109_vm3, %v97_v1, %v112_v43 }
  0x43   :  { %v122_v18 = vsel %vm108_vm4, %v119_v11, %v121_v14  ;;  %v148_v21 = vand.u32 65535, %v118_v17  ;;  %v149_v24 = vshrl.u32 %v118_v17, 16  ;;  %v114_v63 = vsel %vm108_vm4, %v111_v40, %v113_v54 }
  0x44   :  { %v126_v19 = vand.u32 65535, %v122_v18  ;;  %v127_v20 = vshrl.u32 %v122_v18, 16  ;;  %v168_v7 = vmul.u32 %v505_v3, %v114_v63  ;;  %439 = vlog2.f32 %v49_v6 }
  0x45   :  { %v150_v29 = vmul.u32 %v148_v21, %v124_v15  ;;  %v151_v30 = vmul.u32 %v149_v24, %v124_v15  ;;  %v152_v31 = vmul.u32 %v148_v21, %v125_v16  ;;  %v153_v38 = vmul.u32 %v149_v24, %v125_v16 }
  0x46   :  { %v128_v26 = vmul.u32 %v126_v19, %v124_v15  ;;  %v129_v27 = vmul.u32 %v127_v20, %v124_v15  ;;  %v130_v28 = vmul.u32 %v126_v19, %v125_v16  ;;  %v131_v33 = vmul.u32 %v127_v20, %v125_v16 }
  0x47   :  { %v154_v39 = vshll.u32 %v151_v30, 16  ;;  %v156_v42 = vshll.u32 %v152_v31, 16  ;;  %v155_v52 = vshrl.u32 %v151_v30, 16  ;;  %v157_v58 = vshrl.u32 %v152_v31, 16 }
  0x48   :  { %v132_v34 = vshll.u32 %v129_v27, 16  ;;  %v134_v35 = vshll.u32 %v130_v28, 16  ;;  %v133_v48 = vshrl.u32 %v129_v27, 16  ;;  %v135_v55 = vshrl.u32 %v130_v28, 16 }
  0x49   :  { %vm158_vm6 = vc.u32 %v150_v29, %v154_v39  ;;  %v160_v47 = vadd.s32 %v154_v39, %v150_v29 }
  0x4a   :  { %vm136_vm5 = vc.u32 %v128_v26, %v132_v34  ;;  %v138_v41 = vadd.s32 %v132_v34, %v128_v26  ;;  %v159_v50 = vsel %vm158_vm6, 1, %v477_v45  ;;  %v440_v12 = vpop.eup %439  ;;  %vm218_vm6 = vweird.f32 %v495_v32 }
  0x4b   :  { %v137_v46 = vsel %vm136_vm5, 1, %v477_v45  ;;  %v161_v53 = vadd.s32 %v159_v50, %v153_v38  ;;  %vm162_vm8 = vc.u32 %v160_v47, %v156_v42  ;;  %v164_v62 = vadd.s32 %v160_v47, %v156_v42 }
  0x4c   :  { %v139_v49 = vadd.s32 %v137_v46, %v131_v33  ;;  %vm140_vm7 = vc.u32 %v138_v41, %v134_v35  ;;  %v163_v57 = vsel %vm162_vm8, 1, %v477_v45  ;;  %v60_v15 = vmul.f32 0.6931472, %v440_v12 }
  0x4d   :  { %v141_v51 = vsel %vm140_vm7, 1, %v477_v45  ;;  %v165_v59 = vadd.s32 %v163_v57, %v161_v53  ;;  %vm389_vm7 = vcmask 1043456   ;;  %vm391_vm8 = vcmp.lt.s32.totalorder %v489_v2, 33 }
  0x4e   :  { %v143_v56 = vadd.s32 %v141_v51, %v139_v49  ;;  %v536_v17 = vmul.f32 -2.0, %v60_v15 }
  0x4f   :  { %v166_v0 = vadd.s32 %v165_v59, %v155_v52 }
  0x50   :  { %v144_v61 = vadd.s32 %v143_v56, %v133_v48  ;;  %441 = vrsqrt.f32 %v536_v17  ;;  %vm69_vm14 = vcmp.eq.f32.partialorder %v536_v17, inf  ;;  %vm71_vm1 = vcmp.eq.f32.partialorder %v536_v17, 0.0 }
  0x51   :  { %v167_v5 = vadd.s32 %v166_v0, %v157_v58  ;;  %v72_v63 = vand.u32 2147483648, %v536_v17 }
  0x52   :  { %v145_v4 = vadd.s32 %v144_v61, %v135_v55 }
  0x53   :  { %v171_v8 = vadd.s32 1, %v167_v5 }
  0x54   :  { %vm170_vm9 = vc.u32 %v145_v4, %v164_v62  ;;  %v169_v3 = vadd.s32 %v164_v62, %v145_v4 }
  0x55   :  { %v172_v1 = vsel %vm170_vm9, %v171_v8, %v167_v5 }
  0x56   :  { %v173_v9 = vadd.s32 %v172_v1, %v168_v7  ;;  %v442_v26 = vpop.eup %441 }
  0x57   :  { %v63_v31 = vmul.f32 %v442_v26, %v536_v17 }
  0x58   :  { %v174_v10 = vadd.s32 536870912, %v173_v9 }
  0x59   :  { %v64_v35 = vmul.f32 %v442_v26, %v63_v31 }
  0x5a   :  { %v175_v11 = vshrl.u32 %v174_v10, 30 }
  0x5b   :  { %v65_v40 = vmul.f32 0.5, %v64_v35 }
  0x5c   :  { %v176_v13 = vshll.u32 %v175_v11, 30  ;;  %v199_v37 = vsub.s32 4, %v175_v11 }
  0x5d   :  { %v66_v48 = vsub.f32 1.5, %v65_v40 }
  0x5e   :  { %v177_v14 = vsub.s32 %v173_v9, %v176_v13  ;;  %v200_v41 = vsel %vm77_vm12, %v199_v37, %v175_v11 }
  0x5f   :  { %v202_v45 = vsel %vm76_vm13, 0, %v200_v41  ;;  %v67_v54 = vmul.f32 %v442_v26, %v66_v48 }
  0x60   :  { %vm178_vm10 = vcmp.lt.s32.totalorder %v177_v14, 0  ;;  %v179_v44 = vsub.s32 0, %v177_v14  ;;  %v374_v51 = vadd.s32 3, %v202_v45  ;;  %v219_v36 = vand.u32 3, %v202_v45 }
  0x61   :  { %v68_v60 = vmul.f32 %v67_v54, %v536_v17 }
  0x62   :  { %v180_v16 = vsel %vm178_vm10, %v179_v44, %v177_v14  ;;  %v375_v57 = vand.u32 3, %v374_v51  ;;  %vm224_vm15 = vcmp.eq.s32.totalorder %v219_v36, 2  ;;  %vm220_vm2 = vcmp.lt.s32.totalorder %v219_v36, 2 }
  0x63   :  { %v181_v18 = vclz %v180_v16  ;;  %v70_v5 = vsel %vm69_vm14, %v536_v17, %v68_v60  ;;  %vm221_vm3 = vcmp.eq.s32.totalorder %v219_v36, 0 }
  0x64   :  { %vm380_vm0 = vcmp.eq.s32.totalorder %v375_v57, 2  ;;  %vm377_vm4 = vcmp.eq.s32.totalorder %v375_v57, 0  ;;  %vm376_vm5 = vcmp.lt.s32.totalorder %v375_v57, 2  ;;  %v73_v1 = vsel %vm71_vm1, %v72_v63, %v70_v5 }
  0x65   :  { %v426_v19 = vadd.s32 4294967294, %v181_v18 }
  0x67   :  { %vm427_vm11 = vcmp.lt.s32.totalorder %v426_v19, 0 }
  0x68   :  { %v184_v20 = vsel %vm427_vm11, 0, %v426_v19 }
  0x69   :  { %v185_v21 = vsub.s32 32, %v184_v20  ;;  %v186_v22 = vshll.u32 %v177_v14, %v184_v20  ;;  %v189_v23 = vsub.s32 4294967266, %v184_v20 }
  0x6b   :  { %v187_v24 = vshrl.u32 %v169_v3, %v185_v21  ;;  %v190_v25 = vadd.s32 127, %v189_v23 }
  0x6d   :  { %v188_v27 = vor.u32 %v187_v24, %v186_v22  ;;  %v191_v28 = vshll.u32 %v190_v25, 23 }
  0x6f   :  { %v192_v29 = vor.u32 4788187, %v191_v28  ;;  %v195_v30 = vcvt.s32.f32 %v188_v27 }
  0x71   :  { %v193_v33 = vand.u32 2147483647, %v192_v29 }
  0x73   :  { %v196_v34 = vmul.f32 %v195_v30, %v193_v33 }
  0x75   :  { %v197_v38 = vxor.u32 2147483648, %v196_v34 }
  0x77   :  { %v198_v39 = vsel %vm77_vm12, %v197_v38, %v196_v34 }
  0x78   :  { %v201_v42 = vsel %vm76_vm13, %v495_v32, %v198_v39 }
  0x79   :  { %v203_v43 = vmul.f32 %v201_v42, %v201_v42 }
  0x7b   :  { %v204_v46 = vmul.f32 -0.001358992, %v203_v43  ;;  %v211_v47 = vmul.f32 -0.00019511016, %v203_v43 }
  0x7d   :  { %v205_v49 = vadd.f32 0.041655596, %v204_v46  ;;  %v212_v50 = vadd.f32 0.008332121, %v211_v47 }
  0x7f   :  { %v206_v52 = vmul.f32 %v205_v49, %v203_v43  ;;  %v213_v53 = vmul.f32 %v212_v50, %v203_v43 }
  0x81   :  { %v207_v55 = vadd.f32 -0.4999988, %v206_v52  ;;  %v214_v56 = vadd.f32 -0.16666654, %v213_v53 }
  0x83   :  { %v208_v58 = vmul.f32 %v207_v55, %v203_v43  ;;  %v215_v59 = vmul.f32 %v214_v56, %v203_v43 }
  0x85   :  { %v209_v61 = vadd.f32 1.0, %v208_v58  ;;  %v216_v62 = vadd.f32 1.0, %v215_v59 }
  0x87   :  { %v217_v0 = vmul.f32 %v216_v62, %v201_v42  ;;  %v225_v4 = vxor.u32 2147483648, %v209_v61 }
  0x89   :  { %v222_v6 = vxor.u32 2147483648, %v217_v0  ;;  %v226_v7 = vsel %vm224_vm15, %v225_v4, %v217_v0  ;;  %v382_v8 = vsel %vm380_vm0, %v225_v4, %v217_v0 }
  0x8b   :  { %v223_v9 = vsel %vm221_vm3, %v209_v61, %v222_v6  ;;  %v379_v10 = vsel %vm377_vm4, %v209_v61, %v222_v6 }
  0x8c   :  { %v227_v11 = vsel %vm220_vm2, %v223_v9, %v226_v7  ;;  %v383_v12 = vsel %vm376_vm5, %v379_v10, %v382_v8 }
  0x8d   :  { %v228_v13 = vsel %vm218_vm6, nan, %v227_v11  ;;  %v384_v14 = vsel %vm218_vm6, nan, %v383_v12 }
  0x8e   :  { %v229_v15 = vmul.f32 %v228_v13, %v73_v1  ;;  %v385_v44 = vmul.f32 %v384_v14, %v73_v1 }
  0x90   :  { %v387_v16 = vrot.slane %v385_v44, 4 }
  0x92   :  { %v390_v17 = vsel %vm389_vm7, %v229_v15, %v387_v16 }
  0x93   :  { %v392_v18 = vsel %vm391_vm8, %v390_v17, 0.0 }
  0x94   :  { %v393_v19 = vmul.f32 %v392_v18, %v392_v18 }
  0x96   :  { %394 = vadd.xlane.f32.xlu0 %v393_v19 }
 0x109   :  { %v395_v3 = vpop.xlane.xlu0 %394 }
 0x10a   :  { %v396_v20 = vmax.f32 %v395_v3, 1e-24 }
 0x10c   :  { %443 = vrsqrt.f32 %v396_v20  ;;  %vm403_vm10 = vweird.f32 %v396_v20 }
 0x112   :  { %v444_v32 = vpop.eup %443 }
 0x113   :  { %v398_v21 = vmul.f32 %v444_v32, %v396_v20  ;;  %vm404_vm9 = vweird.f32 %v444_v32 }
 0x114   :  { %vm405_vm11 = vmor %vm403_vm10, %vm404_vm9 }
 0x115   :  { %v399_v22 = vmul.f32 %v444_v32, %v398_v21 }
 0x117   :  { %v400_v23 = vmul.f32 0.5, %v399_v22 }
 0x119   :  { %v401_v24 = vsub.f32 1.5, %v400_v23 }
 0x11b   :  { %v402_v25 = vmul.f32 %v444_v32, %v401_v24 }
 0x11d   :  { %v406_v2 = vsel %vm405_vm11, %v444_v32, %v402_v25 }
 0x11e   :  { %v407_v26 = vmul.f32 %v406_v2, %v392_v18 }
 0x120   :  { %408 = vst [vmem:[#allocation3] sm:$0xff] %v407_v26 }
 0x121   :  { %419 = dma.vmem_to_hbm [thread:$0]  %s415_s9, 128, %s417_s12, [#allocation4]  }
 0x122   :  { %469 = dma.done.wait [#allocation4], 128  }
 0x123   :  { %470 = vsyncadd [#allocation4], 4294967168 }
 0x124   :  { %424 = vsyncpa [#allocation4], 1 }

</bundles_post_ra>
